<compile_context>
chip_gen: v5e
topology: v5e:2x2
jax: 0.10.0
libtpu: 0.0.40
codegen_flags: <defaults>
</compile_context>

<pallas_src>
import math

import numpy as np
import jax
import jax.numpy as jnp
from jax.experimental import pallas as pl
from jax.experimental.pallas import tpu as pltpu

LANE = 128                       # last-dim (lane) granularity
SUBLANE = 8                      # second-to-last dim granularity (f32)
MAX_TILE_M = 512                 # measured mem-bound sweet spot for row tiles
VMEM_BUDGET = 48 * 1024 * 1024   # conservative: fits v7x 64 MiB with headroom

_SINGLE_BUFFER_WEIGHTS_OK = None  # cache for the pl.Buffered(1) capability probe


def _round_up(x, m):
    return (x + m - 1) // m * m


def _make_kernel(n_layers, comp_dtype):
    """Fused stack of Linear layers; the activation never leaves VMEM."""

    def kernel(x_ref, *refs):
        o_ref = refs[-1]
        wb = refs[:-1]
        h = x_ref[...]                                   # (tile_m, D0_pad), comp_dtype
        for layer in range(n_layers):
            w = wb[2 * layer][...]                       # (Din_pad, Dout_pad) comp_dtype
            b = wb[2 * layer + 1][...]                   # (1, Dout_pad) f32
            acc = jnp.dot(h, w, preferred_element_type=jnp.float32) + b
            # Round the intermediate activation back to the compute dtype
            # (bf16) for the next MXU pass; keep the final layer in f32.
            h = acc if layer == n_layers - 1 else acc.astype(comp_dtype)
        o_ref[...] = h.astype(o_ref.dtype)

    return kernel


def prepare_mlp_params(params, compute_dtype=jnp.bfloat16):
    """Pad / cast weights & biases ONCE (hoisted out of the forward path).

    params: list of (w, b) with w: (dim_in, dim_out), b: (1, dim_out) or (dim_out,)
    """
    dims = [params[0][0].shape[0]] + [w.shape[1] for w, _ in params]
    dims_pad = [_round_up(d, LANE) for d in dims]

    padded = []
    for layer, (w, b) in enumerate(params):
        di, do = w.shape
        di_p, do_p = dims_pad[layer], dims_pad[layer + 1]
        w_p = jnp.zeros((di_p, do_p), compute_dtype).at[:di, :do].set(
            w.astype(compute_dtype))
        # Bias stays f32: it is added onto the f32 accumulator.
        b_p = jnp.zeros((1, do_p), jnp.float32).at[:, :do].set(
            b.reshape(1, do).astype(jnp.float32))
        padded += [w_p, b_p]

    return {
        "dims": tuple(dims),
        "dims_pad": tuple(dims_pad),
        "padded_wb": tuple(padded),
        "compute_dtype": compute_dtype,
    }


def _vmem_estimate(tile_m, dims_pad, comp_itemsize, out_itemsize):
    w_bytes = sum(di * do for di, do in zip(dims_pad[:-1], dims_pad[1:])) * comp_itemsize
    b_bytes = sum(SUBLANE * do * 4 for do in dims_pad[1:])        # f32 biases, sublane-padded
    x_bytes = 2 * tile_m * dims_pad[0] * comp_itemsize            # double-buffered input tile
    o_bytes = 2 * tile_m * dims_pad[-1] * out_itemsize            # double-buffered output tile
    h_bytes = 2 * tile_m * max(dims_pad) * 4                      # f32 intermediate activations
    return w_bytes + b_bytes + x_bytes + o_bytes + h_bytes


def _choose_tile_m(batch, dims_pad, comp_itemsize, out_itemsize):
    """Largest row tile that fits the VMEM budget, with >= 2 grid steps
    (so v7x's two TensorCores both get work) when the batch allows it."""
    batch8 = _round_up(max(batch, 1), SUBLANE)
    cap = min(MAX_TILE_M, max(SUBLANE, _round_up((batch8 + 1) // 2, SUBLANE)))
    for cand in (512, 384, 256, 192, 128, 96, 64, 32, 16, 8):
        if cand > cap:
            continue
        if _vmem_estimate(cand, dims_pad, comp_itemsize, out_itemsize) <= VMEM_BUDGET:
            return cand
    return SUBLANE


def mlp_forward(x, prepared):
    """Run the whole MLP in a single Pallas kernel dispatch.

    x: (batch, dims[0]); prepared: output of prepare_mlp_params.
    """
    dims = prepared["dims"]
    dims_pad = prepared["dims_pad"]
    padded_wb = prepared["padded_wb"]
    comp_dtype = prepared["compute_dtype"]
    n_layers = len(padded_wb) // 2

    batch, dim_in = x.shape
    assert dim_in == dims[0], f"expected last dim {dims[0]}, got {dim_in}"

    out_dtype = x.dtype
    comp_itemsize = np.dtype(comp_dtype).itemsize
    out_itemsize = np.dtype(out_dtype).itemsize

    tile_m = _choose_tile_m(batch, dims_pad, comp_itemsize, out_itemsize)
    batch_pad = _round_up(batch, tile_m)

    # Pad / cast x only when actually needed.
    if batch_pad == batch and dims_pad[0] == dim_in and x.dtype == comp_dtype:
        x_p = x
    else:
        x_p = jnp.zeros((batch_pad, dims_pad[0]), comp_dtype)
        x_p = x_p.at[:batch, :dim_in].set(x.astype(comp_dtype))

    grid = (batch_pad // tile_m,)

    flops = 2 * batch_pad * sum(
        di * do for di, do in zip(dims_pad[:-1], dims_pad[1:]))
    bytes_accessed = (
        x_p.size * comp_itemsize
        + sum(int(a.size) * a.dtype.itemsize for a in padded_wb)
        + batch_pad * dims_pad[-1] * out_itemsize)

    est = _vmem_estimate(tile_m, dims_pad, comp_itemsize, out_itemsize)
    vmem_limit = int(min(64 * 2**20, max(16 * 2**20, 2 * est)))

    def build_and_run(single_buffer_weights):
        wb_mode = pl.Buffered(1) if single_buffer_weights else None
        in_specs = [pl.BlockSpec((tile_m, dims_pad[0]), lambda i: (i, 0))]
        for layer in range(n_layers):
            di_p, do_p = dims_pad[layer], dims_pad[layer + 1]
            # Weights / biases: constant block index -> resident across all
            # grid steps; request single buffering (no point double-buffering
            # an invariant block).
            in_specs.append(pl.BlockSpec((di_p, do_p), lambda i: (0, 0),
                                         pipeline_mode=wb_mode))
            in_specs.append(pl.BlockSpec((1, do_p), lambda i: (0, 0),
                                         pipeline_mode=wb_mode))
        out_spec = pl.BlockSpec((tile_m, dims_pad[-1]), lambda i: (i, 0))

        call = pl.pallas_call(
            _make_kernel(n_layers, comp_dtype),
            out_shape=jax.ShapeDtypeStruct((batch_pad, dims_pad[-1]), out_dtype),
            grid=grid,
            in_specs=in_specs,
            out_specs=out_spec,
            compiler_params=pltpu.CompilerParams(
                dimension_semantics=("parallel",),     # batch axis: 2-TC split on v7x
                vmem_limit_bytes=vmem_limit,
            ),
            cost_estimate=pl.CostEstimate(
                flops=flops, transcendentals=0, bytes_accessed=bytes_accessed),
        )
        return call(x_p, *padded_wb)

    global _SINGLE_BUFFER_WEIGHTS_OK
    if _SINGLE_BUFFER_WEIGHTS_OK is not False:
        try:
            out_p = build_and_run(True)
            _SINGLE_BUFFER_WEIGHTS_OK = True
        except Exception:
            # Installed Pallas rejected pl.Buffered(1); fall back to defaults.
            _SINGLE_BUFFER_WEIGHTS_OK = False
            out_p = build_and_run(False)
    else:
        out_p = build_and_run(False)

    return out_p[:batch, : dims[-1]]


def init_mlp_params(key, dims):
    """Deterministic init mimicking nn.Linear's U(-1/sqrt(fan_in), 1/sqrt(fan_in))."""
    params = []
    for dim_in, dim_out in zip(dims[:-1], dims[1:]):
        key, kw, kb = jax.random.split(key, 3)
        bound = 1.0 / math.sqrt(dim_in)
        # stored as (dim_in, dim_out) == PyTorch weight (dim_out, dim_in) transposed
        w = jax.random.uniform(kw, (dim_in, dim_out), jnp.float32, -bound, bound)
        b = jax.random.uniform(kb, (1, dim_out), jnp.float32, -bound, bound)
        params.append((w, b))
    return params


def mlp_reference(x, params):
    # act=None in the reference module -> no nonlinearity between layers.
    h = x
    for w, b in params:
        h = h @ w + b
    return h


if __name__ == "__main__":
    key = jax.random.PRNGKey(0)
    dims = [32, 64, 16]          # MLP([32, 64, 16]) -> Linear(32, 64), Linear(64, 16)
    batch = 256                  # tile chooser -> tile_m=128, grid=(2,)

    kx, kp = jax.random.split(key)
    x = jax.random.normal(kx, (batch, dims[0]), jnp.float32)
    params = init_mlp_params(kp, dims)

    ref = mlp_reference(x, params)   # pure-f32 reference (module semantics)

    # 1) bf16 fast path (default): bf16 weights/activations, f32 accumulation.
    prepared_bf16 = prepare_mlp_params(params, compute_dtype=jnp.bfloat16)
    out_bf16 = jax.block_until_ready(mlp_forward(x, prepared_bf16))
    assert out_bf16.shape == (batch, dims[-1])
    assert jnp.allclose(out_bf16, ref, atol=5e-2, rtol=5e-2), "bf16 path mismatch"

    # 2) f32 path: same kernel with f32 storage (matches the module more tightly).
    prepared_f32 = prepare_mlp_params(params, compute_dtype=jnp.float32)
    out_f32 = jax.block_until_ready(mlp_forward(x, prepared_f32))
    assert out_f32.shape == (batch, dims[-1])
    assert jnp.allclose(out_f32, ref, atol=1e-4, rtol=1e-4), "f32 path mismatch"

    print("KERNEL_OK")
</pallas_src>

<mosaic_0001>
module attributes {stable_mosaic.version = 11 : i64} {
  func.func @kernel(%arg0: i32, %arg1: memref<128x128xbf16, #tpu.memory_space<vmem>>, %arg2: memref<128x128xbf16, #tpu.memory_space<vmem>>, %arg3: memref<1x128xf32, #tpu.memory_space<vmem>>, %arg4: memref<128x128xbf16, #tpu.memory_space<vmem>>, %arg5: memref<1x128xf32, #tpu.memory_space<vmem>>, %arg6: memref<128x128xf32, #tpu.memory_space<vmem>>) attributes {dimension_semantics = [#tpu.dimension_semantics<parallel>], iteration_bounds = array<i64: 2>, scalar_prefetch = 0 : i64, scratch_operands = 0 : i64, tpu.core_type = #tpu.core_type<tc>, window_params = [{transform_indices = @transform_0, window_bounds = array<i64: 128, 128>}, {pipeline_mode = #tpu.pipeline_mode<synchronous>, transform_indices = @transform_1, window_bounds = array<i64: 128, 128>}, {pipeline_mode = #tpu.pipeline_mode<synchronous>, transform_indices = @transform_2, window_bounds = array<i64: 1, 128>}, {pipeline_mode = #tpu.pipeline_mode<synchronous>, transform_indices = @transform_3, window_bounds = array<i64: 128, 128>}, {pipeline_mode = #tpu.pipeline_mode<synchronous>, transform_indices = @transform_4, window_bounds = array<i64: 1, 128>}, {transform_indices = @transform_5, window_bounds = array<i64: 128, 128>}]} {
    %c0 = arith.constant 0 : index
    %c0_0 = arith.constant 0 : index
    %0 = vector.load %arg1[%c0, %c0_0] : memref<128x128xbf16, #tpu.memory_space<vmem>>, vector<128x128xbf16>
    %c0_1 = arith.constant 0 : index
    %c0_2 = arith.constant 0 : index
    %1 = vector.load %arg2[%c0_1, %c0_2] : memref<128x128xbf16, #tpu.memory_space<vmem>>, vector<128x128xbf16>
    %c0_3 = arith.constant 0 : index
    %c0_4 = arith.constant 0 : index
    %2 = vector.load %arg3[%c0_3, %c0_4] : memref<1x128xf32, #tpu.memory_space<vmem>>, vector<1x128xf32>
    %cst = arith.constant dense<0.000000e+00> : vector<128x128xf32>
    %3 = tpu.matmul %0, %1, %cst {dimension_numbers = #tpu.dot_dimension_numbers<[1], [0], [0], [1], [0, 0, 1, 1], [], []>} : vector<128x128xbf16>, vector<128x128xbf16>, vector<128x128xf32> -> vector<128x128xf32>
    %4 = vector.broadcast %2 : vector<1x128xf32> to vector<128x128xf32>
    %5 = arith.addf %3, %4 : vector<128x128xf32>
    %6 = arith.truncf %5 : vector<128x128xf32> to vector<128x128xbf16>
    %c0_5 = arith.constant 0 : index
    %c0_6 = arith.constant 0 : index
    %7 = vector.load %arg4[%c0_5, %c0_6] : memref<128x128xbf16, #tpu.memory_space<vmem>>, vector<128x128xbf16>
    %c0_7 = arith.constant 0 : index
    %c0_8 = arith.constant 0 : index
    %8 = vector.load %arg5[%c0_7, %c0_8] : memref<1x128xf32, #tpu.memory_space<vmem>>, vector<1x128xf32>
    %cst_9 = arith.constant dense<0.000000e+00> : vector<128x128xf32>
    %9 = tpu.matmul %6, %7, %cst_9 {dimension_numbers = #tpu.dot_dimension_numbers<[1], [0], [0], [1], [0, 0, 1, 1], [], []>} : vector<128x128xbf16>, vector<128x128xbf16>, vector<128x128xf32> -> vector<128x128xf32>
    %10 = vector.broadcast %8 : vector<1x128xf32> to vector<128x128xf32>
    %11 = arith.addf %9, %10 : vector<128x128xf32>
    %c0_10 = arith.constant 0 : index
    %c0_11 = arith.constant 0 : index
    %12 = vector.load %arg6[%c0_10, %c0_11] : memref<128x128xf32, #tpu.memory_space<vmem>>, vector<128x128xf32>
    tpu.vector_store %arg6[%c0_10, %c0_11], %11 {strides = array<i32>} : memref<128x128xf32, #tpu.memory_space<vmem>>, vector<128x128xf32>,
    return
  }
  func.func @transform_0(%arg0: i32) -> (i32, i32) {
    %c0_i32 = arith.constant 0 : i32
    %c0_i32_0 = arith.constant 0 : i32
    return %arg0, %c0_i32 : i32, i32
  }
  func.func @transform_1(%arg0: i32) -> (i32, i32) {
    %c0_i32 = arith.constant 0 : i32
    %c0_i32_0 = arith.constant 0 : i32
    %c0_i32_1 = arith.constant 0 : i32
    return %c0_i32, %c0_i32_0 : i32, i32
  }
  func.func @transform_2(%arg0: i32) -> (i32, i32) {
    %c0_i32 = arith.constant 0 : i32
    %c0_i32_0 = arith.constant 0 : i32
    %c0_i32_1 = arith.constant 0 : i32
    return %c0_i32, %c0_i32_0 : i32, i32
  }
  func.func @transform_3(%arg0: i32) -> (i32, i32) {
    %c0_i32 = arith.constant 0 : i32
    %c0_i32_0 = arith.constant 0 : i32
    %c0_i32_1 = arith.constant 0 : i32
    return %c0_i32, %c0_i32_0 : i32, i32
  }
  func.func @transform_4(%arg0: i32) -> (i32, i32) {
    %c0_i32 = arith.constant 0 : i32
    %c0_i32_0 = arith.constant 0 : i32
    %c0_i32_1 = arith.constant 0 : i32
    return %c0_i32, %c0_i32_0 : i32, i32
  }
  func.func @transform_5(%arg0: i32) -> (i32, i32) {
    %c0_i32 = arith.constant 0 : i32
    %c0_i32_0 = arith.constant 0 : i32
    return %arg0, %c0_i32 : i32, i32
  }
}

module attributes {stable_mosaic.version = 11 : i64} {
  func.func @kernel(%arg0: i32, %arg1: memref<128x128xbf16, #tpu.memory_space<vmem>>, %arg2: memref<128x128xbf16, #tpu.memory_space<vmem>>, %arg3: memref<1x128xf32, #tpu.memory_space<vmem>>, %arg4: memref<128x128xbf16, #tpu.memory_space<vmem>>, %arg5: memref<1x128xf32, #tpu.memory_space<vmem>>, %arg6: memref<128x128xf32, #tpu.memory_space<vmem>>) attributes {dimension_semantics = [#tpu.dimension_semantics<parallel>], iteration_bounds = array<i64: 2>, scalar_prefetch = 0 : i64, scratch_operands = 0 : i64, tpu.core_type = #tpu.core_type<tc>, window_params = [{transform_indices = @transform_0, window_bounds = array<i64: 128, 128>}, {pipeline_mode = #tpu.pipeline_mode<synchronous>, transform_indices = @transform_1, window_bounds = array<i64: 128, 128>}, {pipeline_mode = #tpu.pipeline_mode<synchronous>, transform_indices = @transform_2, window_bounds = array<i64: 1, 128>}, {pipeline_mode = #tpu.pipeline_mode<synchronous>, transform_indices = @transform_3, window_bounds = array<i64: 128, 128>}, {pipeline_mode = #tpu.pipeline_mode<synchronous>, transform_indices = @transform_4, window_bounds = array<i64: 1, 128>}, {transform_indices = @transform_5, window_bounds = array<i64: 128, 128>}]} {
    %c0 = arith.constant 0 : index
    %c0_0 = arith.constant 0 : index
    %0 = vector.load %arg1[%c0, %c0_0] : memref<128x128xbf16, #tpu.memory_space<vmem>>, vector<128x128xbf16>
    %c0_1 = arith.constant 0 : index
    %c0_2 = arith.constant 0 : index
    %1 = vector.load %arg2[%c0_1, %c0_2] : memref<128x128xbf16, #tpu.memory_space<vmem>>, vector<128x128xbf16>
    %c0_3 = arith.constant 0 : index
    %c0_4 = arith.constant 0 : index
    %2 = vector.load %arg3[%c0_3, %c0_4] : memref<1x128xf32, #tpu.memory_space<vmem>>, vector<1x128xf32>
    %cst = arith.constant dense<0.000000e+00> : vector<128x128xf32>
    %3 = tpu.matmul %0, %1, %cst {dimension_numbers = #tpu.dot_dimension_numbers<[1], [0], [0], [1], [0, 0, 1, 1], [], []>} : vector<128x128xbf16>, vector<128x128xbf16>, vector<128x128xf32> -> vector<128x128xf32>
    %4 = vector.broadcast %2 : vector<1x128xf32> to vector<128x128xf32>
    %5 = arith.addf %3, %4 : vector<128x128xf32>
    %6 = arith.truncf %5 : vector<128x128xf32> to vector<128x128xbf16>
    %c0_5 = arith.constant 0 : index
    %c0_6 = arith.constant 0 : index
    %7 = vector.load %arg4[%c0_5, %c0_6] : memref<128x128xbf16, #tpu.memory_space<vmem>>, vector<128x128xbf16>
    %c0_7 = arith.constant 0 : index
    %c0_8 = arith.constant 0 : index
    %8 = vector.load %arg5[%c0_7, %c0_8] : memref<1x128xf32, #tpu.memory_space<vmem>>, vector<1x128xf32>
    %cst_9 = arith.constant dense<0.000000e+00> : vector<128x128xf32>
    %9 = tpu.matmul %6, %7, %cst_9 {dimension_numbers = #tpu.dot_dimension_numbers<[1], [0], [0], [1], [0, 0, 1, 1], [], []>} : vector<128x128xbf16>, vector<128x128xbf16>, vector<128x128xf32> -> vector<128x128xf32>
    %10 = vector.broadcast %8 : vector<1x128xf32> to vector<128x128xf32>
    %11 = arith.addf %9, %10 : vector<128x128xf32>
    %c0_10 = arith.constant 0 : index
    %c0_11 = arith.constant 0 : index
    %12 = vector.load %arg6[%c0_10, %c0_11] : memref<128x128xf32, #tpu.memory_space<vmem>>, vector<128x128xf32>
    tpu.vector_store %arg6[%c0_10, %c0_11], %11 {strides = array<i32>} : memref<128x128xf32, #tpu.memory_space<vmem>>, vector<128x128xf32>,
    return
  }
  func.func @transform_0(%arg0: i32) -> (i32, i32) {
    %c0_i32 = arith.constant 0 : i32
    %c0_i32_0 = arith.constant 0 : i32
    return %arg0, %c0_i32 : i32, i32
  }
  func.func @transform_1(%arg0: i32) -> (i32, i32) {
    %c0_i32 = arith.constant 0 : i32
    %c0_i32_0 = arith.constant 0 : i32
    %c0_i32_1 = arith.constant 0 : i32
    return %c0_i32, %c0_i32_0 : i32, i32
  }
  func.func @transform_2(%arg0: i32) -> (i32, i32) {
    %c0_i32 = arith.constant 0 : i32
    %c0_i32_0 = arith.constant 0 : i32
    %c0_i32_1 = arith.constant 0 : i32
    return %c0_i32, %c0_i32_0 : i32, i32
  }
  func.func @transform_3(%arg0: i32) -> (i32, i32) {
    %c0_i32 = arith.constant 0 : i32
    %c0_i32_0 = arith.constant 0 : i32
    %c0_i32_1 = arith.constant 0 : i32
    return %c0_i32, %c0_i32_0 : i32, i32
  }
  func.func @transform_4(%arg0: i32) -> (i32, i32) {
    %c0_i32 = arith.constant 0 : i32
    %c0_i32_0 = arith.constant 0 : i32
    %c0_i32_1 = arith.constant 0 : i32
    return %c0_i32, %c0_i32_0 : i32, i32
  }
  func.func @transform_5(%arg0: i32) -> (i32, i32) {
    %c0_i32 = arith.constant 0 : i32
    %c0_i32_0 = arith.constant 0 : i32
    return %arg0, %c0_i32 : i32, i32
  }
}

</mosaic_0001>

<bundles_post_ra>
// kernel: tpu_custom_call.1
= control target key start
LH: loop header
LB: loop body
LE: loop exit
PB: predicated region body
PF: predicated region fallthrough
CT: control target
= control target key end

     0   :  { %10 = vsyncpa [#allocation3], 0  ;;  %s1323_s0 = inlined_call_operand.hbm [shape: bf16[256,128], index: 0, kind: input, shape index: {}]   ;;  %s1324_s1 = inlined_call_operand.hbm [shape: bf16[128,128], index: 1, kind: input, shape index: {}]   ;;  %s1325_s2 = inlined_call_operand.vmem [shape: f32[1,128], index: 2, kind: input, shape index: {}]   ;;  %s1326_s3 = inlined_call_operand.hbm [shape: bf16[128,128], index: 3, kind: input, shape index: {}]   ;;  %s1327_s4 = inlined_call_operand.vmem [shape: f32[1,128], index: 4, kind: input, shape index: {}]   ;;  %s1328_s5 = inlined_call_operand.hbm [shape: f32[256,128], index: 5, kind: output, shape index: {}]  }
   0x1   :  { %12 = vsyncpa [#allocation3 + $0x1], 0 }
   0x2   :  { %13 = vsyncpa [#allocation6], 0 }
   0x3   :  { %14 = vsyncpa [#allocation4], 0 }
   0x4   :  { %16 = vsyncpa [#allocation4 + $0x1], 0  ;;  %s1137_s18 = smov 0   ;;  %s1139_s19 = smov 0  }
   0x5   :  { %s1141_s20 = smov 0   ;;  %s1143_s21 = smov 0  }
   0x6 LB: > { %s1158_s22 = sadd.s32 4294967295, %s1099_s21   ;;  %s710_s23 = sadd.s32 4294967294, %s1099_s21   ;;  %s1099_s21 = sphi %s1143_s21, %s1340_s21   ;;  %s1095_s20 = sphi %s1141_s20, %s1339_s20   ;;  %s1091_s19 = sphi %s1139_s19, %s1338_s19   ;;  %s1087_s18 = sphi %s1137_s18, %s1337_s18  }
   0x7   : > { %p42_p0 = scmp.ne.s32.totalorder %s1091_s19, %s1087_s18  ;;  %p43_p1 = scmp.eq.s32.totalorder %s1158_s22, 0 }
   0x8   : > { %p150_p2 = scmp.eq.s32.totalorder %s1158_s22, 1  ;;  %p156_p3 = scmp.eq.s32.totalorder %s710_s23, 1 }
   0x9   : > { %p1167_p4 = por %p43_p1, %p42_p0  ;;  %p711_p5 = scmp.ge.s32.totalorder %s1099_s21, 1 }
   0xa   : > { %p1172_p6 = por %p156_p3, %p42_p0  ;;  %p163_p7 = scmp.lt.s32.totalorder %s1099_s21, 3 }
   0xb   : > { %s174_s28 = sshll.u32 %s1324_s1, 4  ;;  %s1101_s30 = smov [#allocation5]   ;;  %s175_s28 = int_to_ptr.hbm [resolvable:$true] %s174_s28 }
   0xc   : > { %p1180_p8 = pnand %p711_p5, %p163_p7  ;;  %s176_s6 = sshll.u32 %s1101_s30, 4  ;;  %s177_s6 = int_to_ptr.vmem [resolvable:$true] %s176_s6 }
   0xd   : > { %s191_s9 = sshll.u32 %s1326_s3, 4  ;;  %s1329_s10 = smov 64   ;;  %s192_s9 = int_to_ptr.hbm [resolvable:$true] %s191_s9 }
   0xe   : > { %p878_p9 = pneg %p1180_p8  ;;  %s1103_s11 = smov 4  }
   0xf   : > { %s1104_s12 = smov [#allocation7]   ;;  %s1199_s14 = sadd.s32 1, %s1099_s21  }
  0x10   : > { %p879_p10 = pnand %p878_p9, %p43_p1  ;;  %s193_s13 = sshll.u32 %s1104_s12, 4  ;;  %s194_s13 = int_to_ptr.vmem [resolvable:$true] %s193_s13 }
  0x11   : > { %s29_s15 = sadd.s32 1, %s1095_s20  ;;  %s26_s16 = ssub.s32 %s1099_s21, %s1199_s14 }
  0x12   : > { %881 = dma.hbm_to_vmem [thread:$0]  (!%p879_p10), %s175_s28, 1024, %s177_s6, [#allocation6], %s1329_s10, %s1329_s10, %s1103_s11  }
  0x13   : > { %884 = dma.hbm_to_vmem [thread:$0]  (!%p879_p10), %s192_s9, 1024, %s194_s13, [#allocation6], %s1329_s10, %s1329_s10, %s1103_s11  }
  0x14   : > { %p36_p12 = scmp.ne.s32.totalorder %s1095_s20, %s1091_s19  ;;  %p27_p13 = scmp.eq.s32.totalorder %s26_s16, 0 }
  0x15   : > { %p37_p0 = scmp.eq.s32.totalorder %s1099_s21, 0  ;;  %p895_p5 = scmp.lt.s32.totalorder %s1099_s21, 2 }
  0x16   : > { %p1209_p3 = por %p150_p2, %p36_p12  ;;  %s210_s26 = sand.u32 1, %s1095_s20  }
  0x17   : > { %s1215_s23 = scalar_select %p27_p13, %s1095_s20, %s29_s15  }
  0x18   : > { %p38_p7 = por %p37_p0, %p36_p12  ;;  %s715_s27 = sshll.u32 %s210_s26, 6 }
  0x19   : > { %s824_s28 = sshll.u32 %s1099_s21, 6  ;;  %s214_s8 = scalar_lea.vmem [#allocation2], %s715_s27 }
  0x1a   : > { %s219_s7 = scalar_lea.hbm %s1323_s0, %s824_s28  ;;  %s222_s9 = sshll.u32 %s214_s8, 4  ;;  %s223_s9 = int_to_ptr.vmem [resolvable:$true] %s222_s9 }
  0x1b   : > { %s220_s12 = sshll.u32 %s219_s7, 4  ;;  %p1222_p2 = pnand %p895_p5, %p38_p7  ;;  %s221_s12 = int_to_ptr.hbm [resolvable:$true] %s220_s12 }
  0x1c   : > { %s211_s15 = scalar_lea.sflag [#allocation3], %s210_s26  ;;  %s999_s16 = sshra.s32 %s221_s12, 4  ;;  %s1000_s16 = int_to_ptr.hbm [resolvable:$true] %s999_s16 }
  0x1d   : > { %s1001_s10 = scalar_lea.hbm %s1000_s16, 64  ;;  %p1003_p10 = pneg %p1222_p2 }
  0x1e   : > { %p1002_p9 = scmp.ne.s32.totalorder %s1000_s16, %s1001_s10  ;;  %s1006_s30 = scalar_lea.hbm %s1323_s0, 128 }
  0x1f   : > { %p1007_p0 = scmp.lt.s32.totalorder %s1000_s16, %s1323_s0  ;;  %p1008_p5 = scmp.lt.s32.totalorder %s1006_s30, %s1001_s10 }
  0x20   : > { %p1004_p12 = pnand %p1003_p10, %p1002_p9 }
  0x21   : > { %p1009_p7 = por %p1008_p5, %p1007_p0 }
  0x22   : > { %p1005_p13 = pneg %p1004_p12 }
  0x24   : > { %p1010_p11 = pnand %p1009_p7, %p1005_p13 }
  0x26   : > { %1013 = shalt.err (!%p1010_p11)
}
  0x27   : > { %s1335_s26 = smov 64   ;;  %234 = sbr.rel (%p1180_p8) target bundleno = 417 (0x1a1), region = 40 }
  0x28   : > { %888 = dma.hbm_to_vmem [thread:$0]  (!%p1222_p2), %s221_s12, 1024, %s223_s9, %s211_s15, %s1335_s26, %s1335_s26, %s1103_s11  }
  0x29   : > { %s1242_s8 = sand.u32 (!%p1180_p8), 1, %s1091_s19  }
  0x2a   : > { %s719_s16 = sshll.u32 (!%p1180_p8), %s1242_s8, 6  ;;  %s237_s10 = scalar_lea.sflag (!%p1180_p8), [#allocation3], %s1242_s8 }
  0x2b   : > { %s1246_s28 = scalar_lea.vmem (!%p1180_p8), [#allocation2], %s719_s16 }
  0x2c   : > { %1074 = dma.done.wait (%p1167_p4), %s237_s10, 1024  }
  0x2d   : > { %1076 = vsyncadd (%p1167_p4), %s237_s10, 4294966272 }
  0x2e   : > { %1078 = dma.done.wait (%p43_p1), [#allocation6], 2048  }
  0x2f   : > { %1080 = vsyncadd (%p43_p1), [#allocation6], 4294965248  ;;  %v840_v0 = vld [vmem:[#allocation5 + $0x38] sm:$0xff]  ;;  %v839_v1 = vld [vmem:[#allocation5 + $0x30] sm:$0xff]  ;;  %s722_s11 = sshll.u32 %s1242_s8, 7  ;;  %s849_s15 = sshll.u32 %s1158_s22, 7 }
  0x30   : > { %412 = vmatpush.bf16.msra.mxu0 %v840_v0  ;;  %850 = vmatpush.bf16.msra.mxu2 %v840_v0  ;;  %v838_v2 = vld [vmem:[#allocation5 + $0x28] sm:$0xff]  ;;  %v837_v3 = vld [vmem:[#allocation5 + $0x20] sm:$0xff]  ;;  %v836_v4 = vld [vmem:[#allocation5 + $0x18] sm:$0xff]  ;;  %s1271_s13 = scalar_lea.vmem [#allocation8], %s722_s11  ;;  %s614_s6 = scalar_lea.hbm %s1328_s5, %s849_s15 }
  0x31   : > { %v835_v5 = vld [vmem:[#allocation5 + $0x10] sm:$0xff]  ;;  %v834_v6 = vld [vmem:[#allocation5 + $0x8] sm:$0xff]  ;;  %v833_v7 = vld [vmem:[#allocation5] sm:$0xff]  ;;  %s615_s7 = sshll.u32 %s1271_s13, 4  ;;  %s617_s26 = sshll.u32 %s614_s6, 4  ;;  %s616_s7 = int_to_ptr.vmem [resolvable:$true] %s615_s7  ;;  %s618_s26 = int_to_ptr.hbm [resolvable:$true] %s617_s26 }
  0x32   : > { %v825_v8 = vld [vmem:[%s1246_s28] sm:$0xff]  ;;  %v826_v10 = vld [vmem:[%s1246_s28 + $0x8] sm:$0xff]  ;;  %v848_v12 = vld [vmem:[#allocation7 + $0x38] sm:$0xff]  ;;  %s603_s16 = scalar_lea.sflag [#allocation4], %s1242_s8  ;;  %s1043_s10 = sshra.s32 %s618_s26, 4  ;;  %s1044_s10 = int_to_ptr.hbm [resolvable:$true] %s1043_s10 }
  0x33   : > { %v829_v9 = vld [vmem:[%s1246_s28 + $0x20] sm:$0xff]  ;;  %v830_v11 = vld [vmem:[%s1246_s28 + $0x28] sm:$0xff]  ;;  %537 = vmatpush.bf16.msra.mxu1 %v848_v12  ;;  %v847_v13 = vld [vmem:[#allocation7 + $0x30] sm:$0xff]  ;;  %858 = vmatpush.bf16.msra.mxu3 %v848_v12  ;;  %s1049_s29 = scalar_lea.hbm %s1328_s5, 256  ;;  %p1050_p11 = scmp.lt.s32.totalorder %s1044_s10, %s1328_s5 }
  0x34   : > { %413 = vmatpush.bf16.msra.mxu0 %v839_v1  ;;  %851 = vmatpush.bf16.msra.mxu2 %v839_v1  ;;  %v846_v14 = vld [vmem:[#allocation7 + $0x28] sm:$0xff]  ;;  %v845_v15 = vld [vmem:[#allocation7 + $0x20] sm:$0xff]  ;;  %v827_v16 = vld [vmem:[%s1246_s28 + $0x10] sm:$0xff] }
  0x35   : > { %v831_v17 = vld [vmem:[%s1246_s28 + $0x30] sm:$0xff]  ;;  %v844_v18 = vld [vmem:[#allocation7 + $0x18] sm:$0xff]  ;;  %v842_v22 = vld [vmem:[#allocation7 + $0x8] sm:$0xff] }
  0x36   : > { %v828_v19 = vld [vmem:[%s1246_s28 + $0x18] sm:$0xff]  ;;  %v843_v21 = vld [vmem:[#allocation7 + $0x10] sm:$0xff]  ;;  %v841_v23 = vld [vmem:[#allocation7] sm:$0xff] }
  0x37   : > { %538 = vmatpush.bf16.msra.mxu1 %v847_v13  ;;  %859 = vmatpush.bf16.msra.mxu3 %v847_v13  ;;  %v832_v20 = vld [vmem:[%s1246_s28 + $0x38] sm:$0xff]  ;;  %v937_v25 = vld [vmem:[%s1325_s2] ss:$0 sm:$0xff]  ;;  %s1045_s28 = scalar_lea.hbm %s1044_s10, 128 }
  0x38   : > { %414 = vmatpush.bf16.msra.mxu0 %v838_v2  ;;  %852 = vmatpush.bf16.msra.mxu2 %v838_v2  ;;  %v938_v1 = vld [vmem:[%s1327_s4] ss:$0 sm:$0xff]  ;;  %p1046_p1 = scmp.ne.s32.totalorder %s1044_s10, %s1045_s28  ;;  %p1051_p2 = scmp.lt.s32.totalorder %s1049_s29, %s1045_s28 }
  0x3a   : > { %p1047_p4 = pnand %p1046_p1, %p1209_p3  ;;  %p1052_p9 = por %p1051_p2, %p1050_p11 }
  0x3b   : > { %539 = vmatpush.bf16.msra.mxu1 %v846_v14  ;;  %860 = vmatpush.bf16.msra.mxu3 %v846_v14 }
  0x3c   : > { %415 = vmatpush.bf16.msra.mxu0 %v837_v3  ;;  %853 = vmatpush.bf16.msra.mxu2 %v837_v3  ;;  %p1048_p8 = pneg %p1047_p4 }
  0x3e   : > { %p1053_p10 = pnand %p1052_p9, %p1048_p8 }
  0x3f   : > { %540 = vmatpush.bf16.msra.mxu1 %v845_v15  ;;  %861 = vmatpush.bf16.msra.mxu3 %v845_v15 }
  0x40   : > { %416 = vmatpush.bf16.msra.mxu0 %v836_v4  ;;  %854 = vmatpush.bf16.msra.mxu2 %v836_v4 }
  0x43   : > { %541 = vmatpush.bf16.msra.mxu1 %v844_v18  ;;  %862 = vmatpush.bf16.msra.mxu3 %v844_v18 }
  0x44   : > { %417 = vmatpush.bf16.msra.mxu0 %v835_v5  ;;  %855 = vmatpush.bf16.msra.mxu2 %v835_v5 }
  0x47   : > { %542 = vmatpush.bf16.msra.mxu1 %v843_v21  ;;  %863 = vmatpush.bf16.msra.mxu3 %v843_v21 }
  0x48   : > { %418 = vmatpush.bf16.msra.mxu0 %v834_v6  ;;  %856 = vmatpush.bf16.msra.mxu2 %v834_v6 }
  0x4b   : > { %543 = vmatpush.bf16.msra.mxu1 %v842_v22  ;;  %864 = vmatpush.bf16.msra.mxu3 %v842_v22 }
  0x4c   : > { %419 = vmatpush.bf16.msra.mxu0 %v833_v7  ;;  %857 = vmatpush.bf16.msra.mxu2 %v833_v7 }
  0x4f   : > { %420 = vmatmul.bf16.vlgmr.msra.gmra.mxu0 %v825_v8  ;;  %440 = vmatmul.bf16.vlgmr.msra.gmra.mxu2 %v829_v9 }
  0x50   : > { %544 = vmatpush.bf16.msra.mxu1 %v841_v23  ;;  %865 = vmatpush.bf16.msra.mxu3 %v841_v23 }
  0x5f   : > { %425 = vmatmul.bf16.gmra.mxu0 %v826_v10  ;;  %445 = vmatmul.bf16.gmra.mxu2 %v830_v11 }
  0x6f   : > { %430 = vmatmul.bf16.gmra.mxu0 %v827_v16  ;;  %450 = vmatmul.bf16.gmra.mxu2 %v831_v17 }
  0x7f   : > { %435 = vmatmul.bf16.gmra.mxu0 %v828_v19  ;;  %455 = vmatmul.bf16.gmra.mxu2 %v832_v20 }
  0xcc   : > { %v421_v24 = vpop.f32.mrf.mxu0 }
  0xcd   : > { %v422_v27 = vadd.f32 %v937_v25, %v421_v24 }
  0xd2   : > { %v441_v26 = vpop.f32.mrf.mxu2 }
  0xd3   : > { %v442_v32 = vadd.f32 %v937_v25, %v441_v26 }
  0xd4   : > { %v423_v28 = vpop.f32.mrf.mxu0 }
  0xd5   : > { %v424_v29 = vadd.f32 %v937_v25, %v423_v28 }
  0xd7   : > { %v461_v30 = vpack.c.bf16 %v424_v29, %v422_v27 }
  0xd9   : > { %545 = vmatmul.bf16.vlgmr.msra.gmra.mxu1 %v461_v30 }
  0xda   : > { %v443_v31 = vpop.f32.mrf.mxu2 }
  0xdb   : > { %v444_v33 = vadd.f32 %v937_v25, %v443_v31 }
  0xdc   : > { %v426_v34 = vpop.f32.mrf.mxu0 }
  0xdd   : > { %v465_v35 = vpack.c.bf16 %v444_v33, %v442_v32  ;;  %v427_v37 = vadd.f32 %v937_v25, %v426_v34 }
  0xdf   : > { %565 = vmatmul.bf16.vlgmr.msra.gmra.mxu3 %v465_v35 }
  0xe2   : > { %v446_v36 = vpop.f32.mrf.mxu2 }
  0xe3   : > { %v447_v42 = vadd.f32 %v937_v25, %v446_v36 }
  0xe4   : > { %v428_v38 = vpop.f32.mrf.mxu0 }
  0xe5   : > { %v429_v39 = vadd.f32 %v937_v25, %v428_v38 }
  0xe7   : > { %v462_v40 = vpack.c.bf16 %v429_v39, %v427_v37 }
  0xe9   : > { %550 = vmatmul.bf16.gmra.mxu1 %v462_v40 }
  0xea   : > { %v448_v41 = vpop.f32.mrf.mxu2 }
  0xeb   : > { %v449_v43 = vadd.f32 %v937_v25, %v448_v41 }
  0xec   : > { %v431_v44 = vpop.f32.mrf.mxu0 }
  0xed   : > { %v466_v45 = vpack.c.bf16 %v449_v43, %v447_v42  ;;  %v432_v47 = vadd.f32 %v937_v25, %v431_v44 }
  0xef   : > { %570 = vmatmul.bf16.gmra.mxu3 %v466_v45 }
  0xf2   : > { %v451_v46 = vpop.f32.mrf.mxu2 }
  0xf3   : > { %v452_v52 = vadd.f32 %v937_v25, %v451_v46 }
  0xf4   : > { %v433_v48 = vpop.f32.mrf.mxu0 }
  0xf5   : > { %v434_v49 = vadd.f32 %v937_v25, %v433_v48 }
  0xf7   : > { %v463_v50 = vpack.c.bf16 %v434_v49, %v432_v47 }
  0xf9   : > { %555 = vmatmul.bf16.gmra.mxu1 %v463_v50 }
  0xfa   : > { %v453_v51 = vpop.f32.mrf.mxu2 }
  0xfb   : > { %v454_v53 = vadd.f32 %v937_v25, %v453_v51 }
  0xfc   : > { %v436_v54 = vpop.f32.mrf.mxu0 }
  0xfd   : > { %v467_v55 = vpack.c.bf16 %v454_v53, %v452_v52  ;;  %v437_v57 = vadd.f32 %v937_v25, %v436_v54 }
  0xff   : > { %575 = vmatmul.bf16.gmra.mxu3 %v467_v55 }
 0x102   : > { %v456_v56 = vpop.f32.mrf.mxu2 }
 0x103   : > { %v457_v62 = vadd.f32 %v937_v25, %v456_v56 }
 0x104   : > { %v438_v58 = vpop.f32.mrf.mxu0 }
 0x105   : > { %v439_v59 = vadd.f32 %v937_v25, %v438_v58 }
 0x107   : > { %v464_v60 = vpack.c.bf16 %v439_v59, %v437_v57 }
 0x109   : > { %560 = vmatmul.bf16.gmra.mxu1 %v464_v60 }
 0x10a   : > { %v458_v61 = vpop.f32.mrf.mxu2 }
 0x10b   : > { %v459_v63 = vadd.f32 %v937_v25, %v458_v61 }
 0x10d   : > { %v468_v0 = vpack.c.bf16 %v459_v63, %v457_v62 }
 0x10f   : > { %580 = vmatmul.bf16.gmra.mxu3 %v468_v0 }
 0x156   : > { %v546_v2 = vpop.f32.mrf.mxu1 }
 0x157   : > { %v547_v3 = vadd.f32 %v938_v1, %v546_v2 }
 0x159   : > { %586 = vst [vmem:[%s1271_s13] sm:$0xff] %v547_v3 }
 0x15e   : > { %v548_v4 = vpop.f32.mrf.mxu1 }
 0x15f   : > { %v549_v5 = vadd.f32 %v938_v1, %v548_v4 }
 0x161   : > { %587 = vst [vmem:[%s1271_s13 + $0x8] sm:$0xff] %v549_v5 }
 0x162   : > { %v566_v6 = vpop.f32.mrf.mxu3 }
 0x163   : > { %v567_v7 = vadd.f32 %v938_v1, %v566_v6 }
 0x165   : > { %594 = vst [vmem:[%s1271_s13 + $0x40] sm:$0xff] %v567_v7 }
 0x166   : > { %v551_v8 = vpop.f32.mrf.mxu1 }
 0x167   : > { %v552_v9 = vadd.f32 %v938_v1, %v551_v8 }
 0x169   : > { %588 = vst [vmem:[%s1271_s13 + $0x10] sm:$0xff] %v552_v9 }
 0x16a   : > { %v568_v10 = vpop.f32.mrf.mxu3 }
 0x16b   : > { %v569_v11 = vadd.f32 %v938_v1, %v568_v10 }
 0x16d   : > { %595 = vst [vmem:[%s1271_s13 + $0x48] sm:$0xff] %v569_v11 }
 0x16e   : > { %v553_v12 = vpop.f32.mrf.mxu1 }
 0x16f   : > { %v554_v13 = vadd.f32 %v938_v1, %v553_v12 }
 0x171   : > { %589 = vst [vmem:[%s1271_s13 + $0x18] sm:$0xff] %v554_v13 }
 0x172   : > { %v571_v14 = vpop.f32.mrf.mxu3 }
 0x173   : > { %v572_v15 = vadd.f32 %v938_v1, %v571_v14 }
 0x175   : > { %596 = vst [vmem:[%s1271_s13 + $0x50] sm:$0xff] %v572_v15 }
 0x176   : > { %v556_v16 = vpop.f32.mrf.mxu1 }
 0x177   : > { %v557_v17 = vadd.f32 %v938_v1, %v556_v16 }
 0x179   : > { %590 = vst [vmem:[%s1271_s13 + $0x20] sm:$0xff] %v557_v17 }
 0x17a   : > { %v573_v18 = vpop.f32.mrf.mxu3 }
 0x17b   : > { %v574_v19 = vadd.f32 %v938_v1, %v573_v18 }
 0x17d   : > { %597 = vst [vmem:[%s1271_s13 + $0x58] sm:$0xff] %v574_v19 }
 0x17e   : > { %v558_v20 = vpop.f32.mrf.mxu1 }
 0x17f   : > { %v559_v21 = vadd.f32 %v938_v1, %v558_v20 }
 0x181   : > { %591 = vst [vmem:[%s1271_s13 + $0x28] sm:$0xff] %v559_v21 }
 0x182   : > { %v576_v22 = vpop.f32.mrf.mxu3 }
 0x183   : > { %v577_v23 = vadd.f32 %v938_v1, %v576_v22 }
 0x185   : > { %598 = vst [vmem:[%s1271_s13 + $0x60] sm:$0xff] %v577_v23 }
 0x186   : > { %v561_v24 = vpop.f32.mrf.mxu1 }
 0x187   : > { %v562_v25 = vadd.f32 %v938_v1, %v561_v24 }
 0x189   : > { %592 = vst [vmem:[%s1271_s13 + $0x30] sm:$0xff] %v562_v25 }
 0x18a   : > { %v578_v26 = vpop.f32.mrf.mxu3 }
 0x18b   : > { %v579_v27 = vadd.f32 %v938_v1, %v578_v26 }
 0x18d   : > { %599 = vst [vmem:[%s1271_s13 + $0x68] sm:$0xff] %v579_v27 }
 0x18e   : > { %v563_v28 = vpop.f32.mrf.mxu1 }
 0x18f   : > { %v564_v29 = vadd.f32 %v938_v1, %v563_v28 }
 0x191   : > { %593 = vst [vmem:[%s1271_s13 + $0x38] sm:$0xff] %v564_v29 }
 0x192   : > { %v581_v30 = vpop.f32.mrf.mxu3 }
 0x193   : > { %v582_v31 = vadd.f32 %v938_v1, %v581_v30 }
 0x195   : > { %600 = vst [vmem:[%s1271_s13 + $0x70] sm:$0xff] %v582_v31 }
 0x19a   : > { %v583_v32 = vpop.f32.mrf.mxu3 }
 0x19b   : > { %v584_v33 = vadd.f32 %v938_v1, %v583_v32 }
 0x19d   : > { %601 = vst [vmem:[%s1271_s13 + $0x78] sm:$0xff] %v584_v33 }
 0x19e   : > { %1056 = shalt.err (!%p1053_p10)
}
 0x19f   : > { %s1105_s8 = smov 128   ;;  %s1106_s12 = smov 8  }
 0x1a0   : > { %876 = dma.vmem_to_hbm [thread:$0]  (%p1209_p3), %s616_s7, 2048, %s618_s26, %s603_s16, %s1105_s8, %s1105_s8, %s1106_s12  }
 0x1a1 PF: > { %s632_s13 = sand.u32 1, %s1087_s18   ;;  %p1336_p12 = scmp.ge.s32.totalorder %s1099_s21, 2 }
 0x1a2   : > { %s633_s15 = scalar_lea.sflag [#allocation4], %s632_s13 }
 0x1a3   : > { %p890_p13 = pnand %p1336_p12, %p1172_p6 }
 0x1a5   : > { %p891_p0 = pneg %p890_p13 }
 0x1a7   : > { %1082 = dma.done.wait (%p891_p0), %s633_s15, 2048  }
 0x1a8   : > { %1084 = vsyncadd (%p891_p0), %s633_s15, 4294965248  ;;  %p19_p5 = scmp.ge.s32.totalorder %s1199_s14, 4   ;;  %s1337_s18 = smov %s1091_s19 }
 0x1a9   : > { %s1338_s19 = smov %s1095_s20  ;;  %s1339_s20 = smov %s1215_s23 }
 0x1aa   : > { %s1340_s21 = smov %s1199_s14  ;;  %21 = sbr.rel (!%p19_p5) target bundleno = 6 (0x6), region = 93 }
 0x1af   :  { %639 = vsyncpa [#allocation3], 1 }
 0x1b0   :  { %641 = vsyncpa [#allocation3 + $0x1], 1 }
 0x1b1   :  { %642 = vsyncpa [#allocation6], 1 }
 0x1b2   :  { %643 = vsyncpa [#allocation4], 1 }
 0x1b3   :  { %645 = vsyncpa [#allocation4 + $0x1], 1 }

// kernel: tpu_custom_call.1
= control target key start
LH: loop header
LB: loop body
LE: loop exit
PB: predicated region body
PF: predicated region fallthrough
CT: control target
= control target key end

     0   :  { %10 = vsyncpa [#allocation3], 0  ;;  %s1323_s0 = inlined_call_operand.hbm [shape: bf16[256,128], index: 0, kind: input, shape index: {}]   ;;  %s1324_s1 = inlined_call_operand.hbm [shape: bf16[128,128], index: 1, kind: input, shape index: {}]   ;;  %s1325_s2 = inlined_call_operand.vmem [shape: f32[1,128], index: 2, kind: input, shape index: {}]   ;;  %s1326_s3 = inlined_call_operand.hbm [shape: bf16[128,128], index: 3, kind: input, shape index: {}]   ;;  %s1327_s4 = inlined_call_operand.vmem [shape: f32[1,128], index: 4, kind: input, shape index: {}]   ;;  %s1328_s5 = inlined_call_operand.hbm [shape: f32[256,128], index: 5, kind: output, shape index: {}]  }
   0x1   :  { %12 = vsyncpa [#allocation3 + $0x1], 0 }
   0x2   :  { %13 = vsyncpa [#allocation6], 0 }
   0x3   :  { %14 = vsyncpa [#allocation4], 0 }
   0x4   :  { %16 = vsyncpa [#allocation4 + $0x1], 0  ;;  %s1137_s18 = smov 0   ;;  %s1139_s19 = smov 0  }
   0x5   :  { %s1141_s20 = smov 0   ;;  %s1143_s21 = smov 0  }
   0x6 LB: > { %s1158_s22 = sadd.s32 4294967295, %s1099_s21   ;;  %s710_s23 = sadd.s32 4294967294, %s1099_s21   ;;  %s1099_s21 = sphi %s1143_s21, %s1340_s21   ;;  %s1095_s20 = sphi %s1141_s20, %s1339_s20   ;;  %s1091_s19 = sphi %s1139_s19, %s1338_s19   ;;  %s1087_s18 = sphi %s1137_s18, %s1337_s18  }
   0x7   : > { %p42_p0 = scmp.ne.s32.totalorder %s1091_s19, %s1087_s18  ;;  %p43_p1 = scmp.eq.s32.totalorder %s1158_s22, 0 }
   0x8   : > { %p150_p2 = scmp.eq.s32.totalorder %s1158_s22, 1  ;;  %p156_p3 = scmp.eq.s32.totalorder %s710_s23, 1 }
   0x9   : > { %p1167_p4 = por %p43_p1, %p42_p0  ;;  %p711_p5 = scmp.ge.s32.totalorder %s1099_s21, 1 }
   0xa   : > { %p1172_p6 = por %p156_p3, %p42_p0  ;;  %p163_p7 = scmp.lt.s32.totalorder %s1099_s21, 3 }
   0xb   : > { %s174_s28 = sshll.u32 %s1324_s1, 4  ;;  %s1101_s30 = smov [#allocation5]   ;;  %s175_s28 = int_to_ptr.hbm [resolvable:$true] %s174_s28 }
   0xc   : > { %p1180_p8 = pnand %p711_p5, %p163_p7  ;;  %s176_s6 = sshll.u32 %s1101_s30, 4  ;;  %s177_s6 = int_to_ptr.vmem [resolvable:$true] %s176_s6 }
   0xd   : > { %s191_s9 = sshll.u32 %s1326_s3, 4  ;;  %s1329_s10 = smov 64   ;;  %s192_s9 = int_to_ptr.hbm [resolvable:$true] %s191_s9 }
   0xe   : > { %p878_p9 = pneg %p1180_p8  ;;  %s1103_s11 = smov 4  }
   0xf   : > { %s1104_s12 = smov [#allocation7]   ;;  %s1199_s14 = sadd.s32 1, %s1099_s21  }
  0x10   : > { %p879_p10 = pnand %p878_p9, %p43_p1  ;;  %s193_s13 = sshll.u32 %s1104_s12, 4  ;;  %s194_s13 = int_to_ptr.vmem [resolvable:$true] %s193_s13 }
  0x11   : > { %s29_s15 = sadd.s32 1, %s1095_s20  ;;  %s26_s16 = ssub.s32 %s1099_s21, %s1199_s14 }
  0x12   : > { %881 = dma.hbm_to_vmem [thread:$0]  (!%p879_p10), %s175_s28, 1024, %s177_s6, [#allocation6], %s1329_s10, %s1329_s10, %s1103_s11  }
  0x13   : > { %884 = dma.hbm_to_vmem [thread:$0]  (!%p879_p10), %s192_s9, 1024, %s194_s13, [#allocation6], %s1329_s10, %s1329_s10, %s1103_s11  }
  0x14   : > { %p36_p12 = scmp.ne.s32.totalorder %s1095_s20, %s1091_s19  ;;  %p27_p13 = scmp.eq.s32.totalorder %s26_s16, 0 }
  0x15   : > { %p37_p0 = scmp.eq.s32.totalorder %s1099_s21, 0  ;;  %p895_p5 = scmp.lt.s32.totalorder %s1099_s21, 2 }
  0x16   : > { %p1209_p3 = por %p150_p2, %p36_p12  ;;  %s210_s26 = sand.u32 1, %s1095_s20  }
  0x17   : > { %s1215_s23 = scalar_select %p27_p13, %s1095_s20, %s29_s15  }
  0x18   : > { %p38_p7 = por %p37_p0, %p36_p12  ;;  %s715_s27 = sshll.u32 %s210_s26, 6 }
  0x19   : > { %s824_s28 = sshll.u32 %s1099_s21, 6  ;;  %s214_s8 = scalar_lea.vmem [#allocation2], %s715_s27 }
  0x1a   : > { %s219_s7 = scalar_lea.hbm %s1323_s0, %s824_s28  ;;  %s222_s9 = sshll.u32 %s214_s8, 4  ;;  %s223_s9 = int_to_ptr.vmem [resolvable:$true] %s222_s9 }
  0x1b   : > { %s220_s12 = sshll.u32 %s219_s7, 4  ;;  %p1222_p2 = pnand %p895_p5, %p38_p7  ;;  %s221_s12 = int_to_ptr.hbm [resolvable:$true] %s220_s12 }
  0x1c   : > { %s211_s15 = scalar_lea.sflag [#allocation3], %s210_s26  ;;  %s999_s16 = sshra.s32 %s221_s12, 4  ;;  %s1000_s16 = int_to_ptr.hbm [resolvable:$true] %s999_s16 }
  0x1d   : > { %s1001_s10 = scalar_lea.hbm %s1000_s16, 64  ;;  %p1003_p10 = pneg %p1222_p2 }
  0x1e   : > { %p1002_p9 = scmp.ne.s32.totalorder %s1000_s16, %s1001_s10  ;;  %s1006_s30 = scalar_lea.hbm %s1323_s0, 128 }
  0x1f   : > { %p1007_p0 = scmp.lt.s32.totalorder %s1000_s16, %s1323_s0  ;;  %p1008_p5 = scmp.lt.s32.totalorder %s1006_s30, %s1001_s10 }
  0x20   : > { %p1004_p12 = pnand %p1003_p10, %p1002_p9 }
  0x21   : > { %p1009_p7 = por %p1008_p5, %p1007_p0 }
  0x22   : > { %p1005_p13 = pneg %p1004_p12 }
  0x24   : > { %p1010_p11 = pnand %p1009_p7, %p1005_p13 }
  0x26   : > { %1013 = shalt.err (!%p1010_p11)
}
  0x27   : > { %s1335_s26 = smov 64   ;;  %234 = sbr.rel (%p1180_p8) target bundleno = 417 (0x1a1), region = 40 }
  0x28   : > { %888 = dma.hbm_to_vmem [thread:$0]  (!%p1222_p2), %s221_s12, 1024, %s223_s9, %s211_s15, %s1335_s26, %s1335_s26, %s1103_s11  }
  0x29   : > { %s1242_s8 = sand.u32 (!%p1180_p8), 1, %s1091_s19  }
  0x2a   : > { %s719_s16 = sshll.u32 (!%p1180_p8), %s1242_s8, 6  ;;  %s237_s10 = scalar_lea.sflag (!%p1180_p8), [#allocation3], %s1242_s8 }
  0x2b   : > { %s1246_s28 = scalar_lea.vmem (!%p1180_p8), [#allocation2], %s719_s16 }
  0x2c   : > { %1074 = dma.done.wait (%p1167_p4), %s237_s10, 1024  }
  0x2d   : > { %1076 = vsyncadd (%p1167_p4), %s237_s10, 4294966272 }
  0x2e   : > { %1078 = dma.done.wait (%p43_p1), [#allocation6], 2048  }
  0x2f   : > { %1080 = vsyncadd (%p43_p1), [#allocation6], 4294965248  ;;  %v840_v0 = vld [vmem:[#allocation5 + $0x38] sm:$0xff]  ;;  %v839_v1 = vld [vmem:[#allocation5 + $0x30] sm:$0xff]  ;;  %s722_s11 = sshll.u32 %s1242_s8, 7  ;;  %s849_s15 = sshll.u32 %s1158_s22, 7 }
  0x30   : > { %412 = vmatpush.bf16.msra.mxu0 %v840_v0  ;;  %850 = vmatpush.bf16.msra.mxu2 %v840_v0  ;;  %v838_v2 = vld [vmem:[#allocation5 + $0x28] sm:$0xff]  ;;  %v837_v3 = vld [vmem:[#allocation5 + $0x20] sm:$0xff]  ;;  %v836_v4 = vld [vmem:[#allocation5 + $0x18] sm:$0xff]  ;;  %s1271_s13 = scalar_lea.vmem [#allocation8], %s722_s11  ;;  %s614_s6 = scalar_lea.hbm %s1328_s5, %s849_s15 }
  0x31   : > { %v835_v5 = vld [vmem:[#allocation5 + $0x10] sm:$0xff]  ;;  %v834_v6 = vld [vmem:[#allocation5 + $0x8] sm:$0xff]  ;;  %v833_v7 = vld [vmem:[#allocation5] sm:$0xff]  ;;  %s615_s7 = sshll.u32 %s1271_s13, 4  ;;  %s617_s26 = sshll.u32 %s614_s6, 4  ;;  %s616_s7 = int_to_ptr.vmem [resolvable:$true] %s615_s7  ;;  %s618_s26 = int_to_ptr.hbm [resolvable:$true] %s617_s26 }
  0x32   : > { %v825_v8 = vld [vmem:[%s1246_s28] sm:$0xff]  ;;  %v826_v10 = vld [vmem:[%s1246_s28 + $0x8] sm:$0xff]  ;;  %v848_v12 = vld [vmem:[#allocation7 + $0x38] sm:$0xff]  ;;  %s603_s16 = scalar_lea.sflag [#allocation4], %s1242_s8  ;;  %s1043_s10 = sshra.s32 %s618_s26, 4  ;;  %s1044_s10 = int_to_ptr.hbm [resolvable:$true] %s1043_s10 }
  0x33   : > { %v829_v9 = vld [vmem:[%s1246_s28 + $0x20] sm:$0xff]  ;;  %v830_v11 = vld [vmem:[%s1246_s28 + $0x28] sm:$0xff]  ;;  %537 = vmatpush.bf16.msra.mxu1 %v848_v12  ;;  %v847_v13 = vld [vmem:[#allocation7 + $0x30] sm:$0xff]  ;;  %858 = vmatpush.bf16.msra.mxu3 %v848_v12  ;;  %s1049_s29 = scalar_lea.hbm %s1328_s5, 256  ;;  %p1050_p11 = scmp.lt.s32.totalorder %s1044_s10, %s1328_s5 }
  0x34   : > { %413 = vmatpush.bf16.msra.mxu0 %v839_v1  ;;  %851 = vmatpush.bf16.msra.mxu2 %v839_v1  ;;  %v846_v14 = vld [vmem:[#allocation7 + $0x28] sm:$0xff]  ;;  %v845_v15 = vld [vmem:[#allocation7 + $0x20] sm:$0xff]  ;;  %v827_v16 = vld [vmem:[%s1246_s28 + $0x10] sm:$0xff] }
  0x35   : > { %v831_v17 = vld [vmem:[%s1246_s28 + $0x30] sm:$0xff]  ;;  %v844_v18 = vld [vmem:[#allocation7 + $0x18] sm:$0xff]  ;;  %v842_v22 = vld [vmem:[#allocation7 + $0x8] sm:$0xff] }
  0x36   : > { %v828_v19 = vld [vmem:[%s1246_s28 + $0x18] sm:$0xff]  ;;  %v843_v21 = vld [vmem:[#allocation7 + $0x10] sm:$0xff]  ;;  %v841_v23 = vld [vmem:[#allocation7] sm:$0xff] }
  0x37   : > { %538 = vmatpush.bf16.msra.mxu1 %v847_v13  ;;  %859 = vmatpush.bf16.msra.mxu3 %v847_v13  ;;  %v832_v20 = vld [vmem:[%s1246_s28 + $0x38] sm:$0xff]  ;;  %v937_v25 = vld [vmem:[%s1325_s2] ss:$0 sm:$0xff]  ;;  %s1045_s28 = scalar_lea.hbm %s1044_s10, 128 }
  0x38   : > { %414 = vmatpush.bf16.msra.mxu0 %v838_v2  ;;  %852 = vmatpush.bf16.msra.mxu2 %v838_v2  ;;  %v938_v1 = vld [vmem:[%s1327_s4] ss:$0 sm:$0xff]  ;;  %p1046_p1 = scmp.ne.s32.totalorder %s1044_s10, %s1045_s28  ;;  %p1051_p2 = scmp.lt.s32.totalorder %s1049_s29, %s1045_s28 }
  0x3a   : > { %p1047_p4 = pnand %p1046_p1, %p1209_p3  ;;  %p1052_p9 = por %p1051_p2, %p1050_p11 }
  0x3b   : > { %539 = vmatpush.bf16.msra.mxu1 %v846_v14  ;;  %860 = vmatpush.bf16.msra.mxu3 %v846_v14 }
  0x3c   : > { %415 = vmatpush.bf16.msra.mxu0 %v837_v3  ;;  %853 = vmatpush.bf16.msra.mxu2 %v837_v3  ;;  %p1048_p8 = pneg %p1047_p4 }
  0x3e   : > { %p1053_p10 = pnand %p1052_p9, %p1048_p8 }
  0x3f   : > { %540 = vmatpush.bf16.msra.mxu1 %v845_v15  ;;  %861 = vmatpush.bf16.msra.mxu3 %v845_v15 }
  0x40   : > { %416 = vmatpush.bf16.msra.mxu0 %v836_v4  ;;  %854 = vmatpush.bf16.msra.mxu2 %v836_v4 }
  0x43   : > { %541 = vmatpush.bf16.msra.mxu1 %v844_v18  ;;  %862 = vmatpush.bf16.msra.mxu3 %v844_v18 }
  0x44   : > { %417 = vmatpush.bf16.msra.mxu0 %v835_v5  ;;  %855 = vmatpush.bf16.msra.mxu2 %v835_v5 }
  0x47   : > { %542 = vmatpush.bf16.msra.mxu1 %v843_v21  ;;  %863 = vmatpush.bf16.msra.mxu3 %v843_v21 }
  0x48   : > { %418 = vmatpush.bf16.msra.mxu0 %v834_v6  ;;  %856 = vmatpush.bf16.msra.mxu2 %v834_v6 }
  0x4b   : > { %543 = vmatpush.bf16.msra.mxu1 %v842_v22  ;;  %864 = vmatpush.bf16.msra.mxu3 %v842_v22 }
  0x4c   : > { %419 = vmatpush.bf16.msra.mxu0 %v833_v7  ;;  %857 = vmatpush.bf16.msra.mxu2 %v833_v7 }
  0x4f   : > { %420 = vmatmul.bf16.vlgmr.msra.gmra.mxu0 %v825_v8  ;;  %440 = vmatmul.bf16.vlgmr.msra.gmra.mxu2 %v829_v9 }
  0x50   : > { %544 = vmatpush.bf16.msra.mxu1 %v841_v23  ;;  %865 = vmatpush.bf16.msra.mxu3 %v841_v23 }
  0x5f   : > { %425 = vmatmul.bf16.gmra.mxu0 %v826_v10  ;;  %445 = vmatmul.bf16.gmra.mxu2 %v830_v11 }
  0x6f   : > { %430 = vmatmul.bf16.gmra.mxu0 %v827_v16  ;;  %450 = vmatmul.bf16.gmra.mxu2 %v831_v17 }
  0x7f   : > { %435 = vmatmul.bf16.gmra.mxu0 %v828_v19  ;;  %455 = vmatmul.bf16.gmra.mxu2 %v832_v20 }
  0xcc   : > { %v421_v24 = vpop.f32.mrf.mxu0 }
  0xcd   : > { %v422_v27 = vadd.f32 %v937_v25, %v421_v24 }
  0xd2   : > { %v441_v26 = vpop.f32.mrf.mxu2 }
  0xd3   : > { %v442_v32 = vadd.f32 %v937_v25, %v441_v26 }
  0xd4   : > { %v423_v28 = vpop.f32.mrf.mxu0 }
  0xd5   : > { %v424_v29 = vadd.f32 %v937_v25, %v423_v28 }
  0xd7   : > { %v461_v30 = vpack.c.bf16 %v424_v29, %v422_v27 }
  0xd9   : > { %545 = vmatmul.bf16.vlgmr.msra.gmra.mxu1 %v461_v30 }
  0xda   : > { %v443_v31 = vpop.f32.mrf.mxu2 }
  0xdb   : > { %v444_v33 = vadd.f32 %v937_v25, %v443_v31 }
  0xdc   : > { %v426_v34 = vpop.f32.mrf.mxu0 }
  0xdd   : > { %v465_v35 = vpack.c.bf16 %v444_v33, %v442_v32  ;;  %v427_v37 = vadd.f32 %v937_v25, %v426_v34 }
  0xdf   : > { %565 = vmatmul.bf16.vlgmr.msra.gmra.mxu3 %v465_v35 }
  0xe2   : > { %v446_v36 = vpop.f32.mrf.mxu2 }
  0xe3   : > { %v447_v42 = vadd.f32 %v937_v25, %v446_v36 }
  0xe4   : > { %v428_v38 = vpop.f32.mrf.mxu0 }
  0xe5   : > { %v429_v39 = vadd.f32 %v937_v25, %v428_v38 }
  0xe7   : > { %v462_v40 = vpack.c.bf16 %v429_v39, %v427_v37 }
  0xe9   : > { %550 = vmatmul.bf16.gmra.mxu1 %v462_v40 }
  0xea   : > { %v448_v41 = vpop.f32.mrf.mxu2 }
  0xeb   : > { %v449_v43 = vadd.f32 %v937_v25, %v448_v41 }
  0xec   : > { %v431_v44 = vpop.f32.mrf.mxu0 }
  0xed   : > { %v466_v45 = vpack.c.bf16 %v449_v43, %v447_v42  ;;  %v432_v47 = vadd.f32 %v937_v25, %v431_v44 }
  0xef   : > { %570 = vmatmul.bf16.gmra.mxu3 %v466_v45 }
  0xf2   : > { %v451_v46 = vpop.f32.mrf.mxu2 }
  0xf3   : > { %v452_v52 = vadd.f32 %v937_v25, %v451_v46 }
  0xf4   : > { %v433_v48 = vpop.f32.mrf.mxu0 }
  0xf5   : > { %v434_v49 = vadd.f32 %v937_v25, %v433_v48 }
  0xf7   : > { %v463_v50 = vpack.c.bf16 %v434_v49, %v432_v47 }
  0xf9   : > { %555 = vmatmul.bf16.gmra.mxu1 %v463_v50 }
  0xfa   : > { %v453_v51 = vpop.f32.mrf.mxu2 }
  0xfb   : > { %v454_v53 = vadd.f32 %v937_v25, %v453_v51 }
  0xfc   : > { %v436_v54 = vpop.f32.mrf.mxu0 }
  0xfd   : > { %v467_v55 = vpack.c.bf16 %v454_v53, %v452_v52  ;;  %v437_v57 = vadd.f32 %v937_v25, %v436_v54 }
  0xff   : > { %575 = vmatmul.bf16.gmra.mxu3 %v467_v55 }
 0x102   : > { %v456_v56 = vpop.f32.mrf.mxu2 }
 0x103   : > { %v457_v62 = vadd.f32 %v937_v25, %v456_v56 }
 0x104   : > { %v438_v58 = vpop.f32.mrf.mxu0 }
 0x105   : > { %v439_v59 = vadd.f32 %v937_v25, %v438_v58 }
 0x107   : > { %v464_v60 = vpack.c.bf16 %v439_v59, %v437_v57 }
 0x109   : > { %560 = vmatmul.bf16.gmra.mxu1 %v464_v60 }
 0x10a   : > { %v458_v61 = vpop.f32.mrf.mxu2 }
 0x10b   : > { %v459_v63 = vadd.f32 %v937_v25, %v458_v61 }
 0x10d   : > { %v468_v0 = vpack.c.bf16 %v459_v63, %v457_v62 }
 0x10f   : > { %580 = vmatmul.bf16.gmra.mxu3 %v468_v0 }
 0x156   : > { %v546_v2 = vpop.f32.mrf.mxu1 }
 0x157   : > { %v547_v3 = vadd.f32 %v938_v1, %v546_v2 }
 0x159   : > { %586 = vst [vmem:[%s1271_s13] sm:$0xff] %v547_v3 }
 0x15e   : > { %v548_v4 = vpop.f32.mrf.mxu1 }
 0x15f   : > { %v549_v5 = vadd.f32 %v938_v1, %v548_v4 }
 0x161   : > { %587 = vst [vmem:[%s1271_s13 + $0x8] sm:$0xff] %v549_v5 }
 0x162   : > { %v566_v6 = vpop.f32.mrf.mxu3 }
 0x163   : > { %v567_v7 = vadd.f32 %v938_v1, %v566_v6 }
 0x165   : > { %594 = vst [vmem:[%s1271_s13 + $0x40] sm:$0xff] %v567_v7 }
 0x166   : > { %v551_v8 = vpop.f32.mrf.mxu1 }
 0x167   : > { %v552_v9 = vadd.f32 %v938_v1, %v551_v8 }
 0x169   : > { %588 = vst [vmem:[%s1271_s13 + $0x10] sm:$0xff] %v552_v9 }
 0x16a   : > { %v568_v10 = vpop.f32.mrf.mxu3 }
 0x16b   : > { %v569_v11 = vadd.f32 %v938_v1, %v568_v10 }
 0x16d   : > { %595 = vst [vmem:[%s1271_s13 + $0x48] sm:$0xff] %v569_v11 }
 0x16e   : > { %v553_v12 = vpop.f32.mrf.mxu1 }
 0x16f   : > { %v554_v13 = vadd.f32 %v938_v1, %v553_v12 }
 0x171   : > { %589 = vst [vmem:[%s1271_s13 + $0x18] sm:$0xff] %v554_v13 }
 0x172   : > { %v571_v14 = vpop.f32.mrf.mxu3 }
 0x173   : > { %v572_v15 = vadd.f32 %v938_v1, %v571_v14 }
 0x175   : > { %596 = vst [vmem:[%s1271_s13 + $0x50] sm:$0xff] %v572_v15 }
 0x176   : > { %v556_v16 = vpop.f32.mrf.mxu1 }
 0x177   : > { %v557_v17 = vadd.f32 %v938_v1, %v556_v16 }
 0x179   : > { %590 = vst [vmem:[%s1271_s13 + $0x20] sm:$0xff] %v557_v17 }
 0x17a   : > { %v573_v18 = vpop.f32.mrf.mxu3 }
 0x17b   : > { %v574_v19 = vadd.f32 %v938_v1, %v573_v18 }
 0x17d   : > { %597 = vst [vmem:[%s1271_s13 + $0x58] sm:$0xff] %v574_v19 }
 0x17e   : > { %v558_v20 = vpop.f32.mrf.mxu1 }
 0x17f   : > { %v559_v21 = vadd.f32 %v938_v1, %v558_v20 }
 0x181   : > { %591 = vst [vmem:[%s1271_s13 + $0x28] sm:$0xff] %v559_v21 }
 0x182   : > { %v576_v22 = vpop.f32.mrf.mxu3 }
 0x183   : > { %v577_v23 = vadd.f32 %v938_v1, %v576_v22 }
 0x185   : > { %598 = vst [vmem:[%s1271_s13 + $0x60] sm:$0xff] %v577_v23 }
 0x186   : > { %v561_v24 = vpop.f32.mrf.mxu1 }
 0x187   : > { %v562_v25 = vadd.f32 %v938_v1, %v561_v24 }
 0x189   : > { %592 = vst [vmem:[%s1271_s13 + $0x30] sm:$0xff] %v562_v25 }
 0x18a   : > { %v578_v26 = vpop.f32.mrf.mxu3 }
 0x18b   : > { %v579_v27 = vadd.f32 %v938_v1, %v578_v26 }
 0x18d   : > { %599 = vst [vmem:[%s1271_s13 + $0x68] sm:$0xff] %v579_v27 }
 0x18e   : > { %v563_v28 = vpop.f32.mrf.mxu1 }
 0x18f   : > { %v564_v29 = vadd.f32 %v938_v1, %v563_v28 }
 0x191   : > { %593 = vst [vmem:[%s1271_s13 + $0x38] sm:$0xff] %v564_v29 }
 0x192   : > { %v581_v30 = vpop.f32.mrf.mxu3 }
 0x193   : > { %v582_v31 = vadd.f32 %v938_v1, %v581_v30 }
 0x195   : > { %600 = vst [vmem:[%s1271_s13 + $0x70] sm:$0xff] %v582_v31 }
 0x19a   : > { %v583_v32 = vpop.f32.mrf.mxu3 }
 0x19b   : > { %v584_v33 = vadd.f32 %v938_v1, %v583_v32 }
 0x19d   : > { %601 = vst [vmem:[%s1271_s13 + $0x78] sm:$0xff] %v584_v33 }
 0x19e   : > { %1056 = shalt.err (!%p1053_p10)
}
 0x19f   : > { %s1105_s8 = smov 128   ;;  %s1106_s12 = smov 8  }
 0x1a0   : > { %876 = dma.vmem_to_hbm [thread:$0]  (%p1209_p3), %s616_s7, 2048, %s618_s26, %s603_s16, %s1105_s8, %s1105_s8, %s1106_s12  }
 0x1a1 PF: > { %s632_s13 = sand.u32 1, %s1087_s18   ;;  %p1336_p12 = scmp.ge.s32.totalorder %s1099_s21, 2 }
 0x1a2   : > { %s633_s15 = scalar_lea.sflag [#allocation4], %s632_s13 }
 0x1a3   : > { %p890_p13 = pnand %p1336_p12, %p1172_p6 }
 0x1a5   : > { %p891_p0 = pneg %p890_p13 }
 0x1a7   : > { %1082 = dma.done.wait (%p891_p0), %s633_s15, 2048  }
 0x1a8   : > { %1084 = vsyncadd (%p891_p0), %s633_s15, 4294965248  ;;  %p19_p5 = scmp.ge.s32.totalorder %s1199_s14, 4   ;;  %s1337_s18 = smov %s1091_s19 }
 0x1a9   : > { %s1338_s19 = smov %s1095_s20  ;;  %s1339_s20 = smov %s1215_s23 }
 0x1aa   : > { %s1340_s21 = smov %s1199_s14  ;;  %21 = sbr.rel (!%p19_p5) target bundleno = 6 (0x6), region = 93 }
 0x1af   :  { %639 = vsyncpa [#allocation3], 1 }
 0x1b0   :  { %641 = vsyncpa [#allocation3 + $0x1], 1 }
 0x1b1   :  { %642 = vsyncpa [#allocation6], 1 }
 0x1b2   :  { %643 = vsyncpa [#allocation4], 1 }
 0x1b3   :  { %645 = vsyncpa [#allocation4 + $0x1], 1 }

</bundles_post_ra>
